<compile_context>
chip_gen: v5e
topology: v5e:2x2
jax: 0.10.0
libtpu: 0.0.40
codegen_flags: <defaults>
</compile_context>

<pallas_src>
import functools

import jax
import jax.numpy as jnp
from jax.experimental import pallas as pl
from jax.experimental.pallas import tpu as pltpu

F32 = jnp.float32
BF16 = jnp.bfloat16

TM_MAX, TN_MAX, TK_MAX = 512, 512, 2048


def _round_up(x, m):
    return (x + m - 1) // m * m


def _pick_div(n, max_t, step=128):
    """Largest multiple of `step` <= max_t that divides n (n a multiple of step)."""
    t = min(max_t, n)
    t -= t % step
    while n % t:
        t -= step
    return t


# ---------------------------------------------------------------------------
# Pallas kernels
# ---------------------------------------------------------------------------
def _mm_fused_kernel(*refs, relu_pre, relu_post, has_add):
    """out = post_relu( scale * pre_relu(A@B + bias) + shift ) [+ add]"""
    if has_add:
        a_ref, b_ref, bias_ref, scale_ref, shift_ref, add_ref, o_ref, acc_ref = refs
    else:
        a_ref, b_ref, bias_ref, scale_ref, shift_ref, o_ref, acc_ref = refs
        add_ref = None
    k = pl.program_id(2)

    @pl.when(k == 0)
    def _():
        acc_ref[...] = jnp.zeros_like(acc_ref)

    acc_ref[...] += jnp.dot(a_ref[...], b_ref[...],
                            preferred_element_type=jnp.float32)

    @pl.when(k == pl.num_programs(2) - 1)
    def _():
        y = acc_ref[...] + bias_ref[...]
        if relu_pre:
            y = jnp.maximum(y, 0.0)
        y = y * scale_ref[...] + shift_ref[...]
        if relu_post:
            y = jnp.maximum(y, 0.0)
        if has_add:
            y = y + add_ref[...]
        o_ref[...] = y.astype(o_ref.dtype)


def matmul_fused(a, b, bias, scale, shift, relu_pre=False, relu_post=False,
                 add=None):
    """a: (M, K) bf16 patches.  b: (Kp, Np) bf16 prepared weights (K, N already
    zero-padded to multiples of 128).  bias/scale/shift: (1, Np) f32.
    add: optional (M, Np)-ish f32 residual added after the epilogue.
    Returns (M, Np) f32."""
    M, K = a.shape
    Kp, Np = b.shape
    if K != Kp:                       # only the tiny encoder convs hit this
        a = jnp.pad(a, ((0, 0), (0, Kp - K)))
    if M <= TM_MAX:                   # small-M layers: single M block, no pad
        Mp = _round_up(M, 8)
        tm = Mp
    else:
        Mp = _round_up(M, 128)
        tm = _pick_div(Mp, TM_MAX)
    if Mp != M:
        a = jnp.pad(a, ((0, Mp - M), (0, 0)))
    tn = _pick_div(Np, TN_MAX)
    tk = _pick_div(Kp, TK_MAX)

    has_add = add is not None
    operands = [a, b, bias, scale, shift]
    in_specs = [
        pl.BlockSpec((tm, tk), lambda i, j, k: (i, k)),
        pl.BlockSpec((tk, tn), lambda i, j, k: (k, j)),
        pl.BlockSpec((1, tn), lambda i, j, k: (0, j)),
        pl.BlockSpec((1, tn), lambda i, j, k: (0, j)),
        pl.BlockSpec((1, tn), lambda i, j, k: (0, j)),
    ]
    if has_add:
        if add.shape != (Mp, Np):
            add = jnp.pad(add, ((0, Mp - add.shape[0]), (0, Np - add.shape[1])))
        operands.append(add)
        in_specs.append(pl.BlockSpec((tm, tn), lambda i, j, k: (i, j)))

    kern = functools.partial(_mm_fused_kernel, relu_pre=relu_pre,
                             relu_post=relu_post, has_add=has_add)
    out = pl.pallas_call(
        kern,
        out_shape=jax.ShapeDtypeStruct((Mp, Np), F32),
        grid_spec=pltpu.PrefetchScalarGridSpec(
            num_scalar_prefetch=0,
            grid=(Mp // tm, Np // tn, Kp // tk),
            in_specs=in_specs,
            out_specs=pl.BlockSpec((tm, tn), lambda i, j, k: (i, j)),
            scratch_shapes=[pltpu.VMEM((tm, tn), jnp.float32)],
        ),
        compiler_params=pltpu.CompilerParams(
            dimension_semantics=("parallel", "parallel", "arbitrary"),
            vmem_limit_bytes=32 * 1024 * 1024),
    )(*operands)
    return out[:M]


def _affine_kernel(x_ref, scale_ref, shift_ref, o_ref, *, relu_pre, relu_post):
    y = x_ref[...]
    if relu_pre:
        y = jnp.maximum(y, 0.0)
    y = y * scale_ref[...] + shift_ref[...]
    if relu_post:
        y = jnp.maximum(y, 0.0)
    o_ref[...] = y


def affine_act(x, scale, shift, relu_pre=False, relu_post=False, tr_max=512):
    """Per-channel affine (folded BatchNorm) + optional ReLU on an NHWC tensor."""
    shape = x.shape
    C = shape[-1]
    x2 = x.reshape(-1, C)
    R = x2.shape[0]
    Cp = _round_up(C, 128)
    tr = min(tr_max, _round_up(R, 8))
    Rp = _round_up(R, tr)
    if (Rp, Cp) != (R, C):
        x2 = jnp.pad(x2, ((0, Rp - R), (0, Cp - C)))
    scale = jnp.pad(scale, (0, Cp - C)).reshape(1, Cp)
    shift = jnp.pad(shift, (0, Cp - C)).reshape(1, Cp)
    kern = functools.partial(_affine_kernel, relu_pre=relu_pre,
                             relu_post=relu_post)
    out = pl.pallas_call(
        kern,
        out_shape=jax.ShapeDtypeStruct((Rp, Cp), F32),
        grid_spec=pltpu.PrefetchScalarGridSpec(
            num_scalar_prefetch=0,
            grid=(Rp // tr,),
            in_specs=[
                pl.BlockSpec((tr, Cp), lambda i: (i, 0)),
                pl.BlockSpec((1, Cp), lambda i: (0, 0)),
                pl.BlockSpec((1, Cp), lambda i: (0, 0)),
            ],
            out_specs=pl.BlockSpec((tr, Cp), lambda i: (i, 0)),
        ),
        compiler_params=pltpu.CompilerParams(
            dimension_semantics=("arbitrary",)),
    )(x2, scale, shift)
    return out[:R, :C].reshape(shape)


# ---------------------------------------------------------------------------
# Conv / layout glue
# ---------------------------------------------------------------------------
def conv2d_fused(x, cp, stride=1, relu_pre=False, relu_post=False, add=None):
    """x: NHWC.  cp: prepared conv dict from _prep_conv (bf16, lane-padded
    weights).  Computes post_relu( scale * pre_relu(conv(x)+bias) + shift )
    [+ add], returning NHWC with cp['nout'] channels."""
    kh, kw = cp["kh"], cp["kw"]
    pad = (kh - 1) // 2
    N, H, W, C = x.shape
    assert C == cp["cin"], (C, cp["cin"])
    Ho = (H + 2 * pad - kh) // stride + 1
    Wo = (W + 2 * pad - kw) // stride + 1
    xb = x.astype(BF16)
    if kh == 1 and kw == 1 and stride == 1:
        patches = xb.reshape(N * H * W, C)
    else:
        xp = jnp.pad(xb, ((0, 0), (pad, pad), (pad, pad), (0, 0)))
        cols = []
        for dy in range(kh):
            for dx in range(kw):
                cols.append(xp[:, dy:dy + (Ho - 1) * stride + 1:stride,
                               dx:dx + (Wo - 1) * stride + 1:stride, :])
        patches = jnp.concatenate(cols, axis=-1).reshape(N * Ho * Wo,
                                                         kh * kw * C)
    add2 = None
    if add is not None:
        add2 = add.reshape(N * Ho * Wo, add.shape[-1]).astype(F32)
    y = matmul_fused(patches, cp["wm"], cp["bias"], cp["scale"], cp["shift"],
                     relu_pre=relu_pre, relu_post=relu_post, add=add2)
    return y[:, :cp["nout"]].reshape(N, Ho, Wo, cp["nout"])


def pixel_shuffle(x, r):
    """torch.nn.PixelShuffle(r) semantics (NCHW), expressed on NHWC."""
    N, H, W, CRR = x.shape
    C = CRR // (r * r)
    x = x.reshape(N, H, W, C, r, r)
    x = jnp.transpose(x, (0, 1, 4, 2, 5, 3))
    return x.reshape(N, H * r, W * r, C)


def nearest_resize(x, hw):
    """F.interpolate(mode='nearest') semantics on NHWC."""
    N, H, W, _ = x.shape
    th, tw = hw
    hi = (jnp.arange(th) * H) // th
    wi = (jnp.arange(tw) * W) // tw
    return x[:, hi][:, :, wi]


# ---------------------------------------------------------------------------
# One-time weight preparation (hoisted out of the forward path)
# ---------------------------------------------------------------------------
def _prep_conv(w, b, bn_scale=None, bn_shift=None, cin_pad=None, nout=None):
    """Fold a PyTorch-layout conv weight + bias + eval-mode BN affine into
    matmul-ready bf16 / lane-padded operands.  cin_pad: expected (zero-padded)
    input channel count; nout: output channels to keep after the matmul."""
    cout, cin, kh, kw = w.shape
    cin_pad = cin if cin_pad is None else cin_pad
    K = kh * kw * cin_pad
    Kp = _round_up(K, 128)
    Np = _round_up(cout, 128)
    wm = jnp.transpose(w, (2, 3, 1, 0))                       # (kh, kw, cin, cout)
    wm = jnp.pad(wm, ((0, 0), (0, 0), (0, cin_pad - cin), (0, 0)))
    wm = wm.reshape(K, cout)
    wm = jnp.pad(wm, ((0, Kp - K), (0, Np - cout))).astype(BF16)
    if b is None:
        b = jnp.zeros((cout,), F32)
    if bn_scale is None:
        bn_scale = jnp.ones((cout,), F32)
    if bn_shift is None:
        bn_shift = jnp.zeros((cout,), F32)
    return {
        "wm": wm,
        "bias": jnp.pad(b, (0, Np - cout)).reshape(1, Np),
        "scale": jnp.pad(bn_scale, (0, Np - cout)).reshape(1, Np),
        "shift": jnp.pad(bn_shift, (0, Np - cout)).reshape(1, Np),
        "kh": kh, "kw": kw, "cin": cin_pad,
        "nout": cout if nout is None else nout,
    }


def build_params(key, n_classes=3):
    keys = iter(jax.random.split(key, 256))
    nxt = lambda: next(keys)

    def conv_w(cin, cout, ksz, bias):
        std = (2.0 / (cin * ksz * ksz)) ** 0.5                # kaiming_normal_
        w = std * jax.random.normal(nxt(), (cout, cin, ksz, ksz), F32)
        b = (0.02 * jax.random.normal(nxt(), (cout,), F32) if bias else None)
        return w, b

    def bn(c):  # eval-mode BatchNorm folded into (scale, shift)
        gamma = 1.0 + 0.1 * jax.random.normal(nxt(), (c,), F32)
        beta = 0.05 * jax.random.normal(nxt(), (c,), F32)
        mean = 0.05 * jax.random.normal(nxt(), (c,), F32)
        var = 1.0 + 0.1 * jnp.abs(jax.random.normal(nxt(), (c,), F32))
        scale = gamma * jax.lax.rsqrt(var + 1e-5)
        shift = beta - mean * scale
        return scale, shift

    p = {"n_classes": n_classes}
    # synthetic encoder: features (64/2, 256/4, 512/8, 1024/16, 2048/32)
    enc_ch = [(n_classes, 64), (64, 256), (256, 512), (512, 1024), (1024, 2048)]
    p["enc"] = [_prep_conv(*conv_w(ci, co, 3, True)) for ci, co in enc_ch]
    # layers_mid: BatchNorm2d(2048), ReLU, middle_conv (2048->4096->2048)
    p["mid_bn"] = bn(2048)
    p["mid"] = []
    for ci, co in [(2048, 4096), (4096, 2048)]:
        w, b = conv_w(ci, co, 3, False)          # bias=False (extra_bn)
        p["mid"].append(_prep_conv(w, b, *bn(co)))
    # layers_dec: UnetBlockWide x4, nf = 1024
    dec_cfg = [(2048, 1024, 1024), (512, 512, 1024), (512, 256, 1024), (512, 64, 512)]
    p["dec"] = []
    for up_in_c, x_in_c, n_out in dec_cfg:
        up_out = n_out // 2
        cat_c = up_out + x_in_c
        cat_cp = _round_up(cat_c, 128)           # lane-pad concat so K is 128-aligned
        ws, _ = conv_w(up_in_c, up_out * 4, 1, False)
        wc, _ = conv_w(cat_c, up_out, 3, False)
        p["dec"].append({
            "shuf": _prep_conv(ws, None, *bn(up_out * 4)),
            "bn_s": bn(x_in_c),
            "conv": _prep_conv(wc, None, *bn(up_out), cin_pad=cat_cp),
            "cat_pad": cat_cp - cat_c,
        })
    # layers_post
    ni = 256 + n_classes
    nip = _round_up(ni, 128)                     # 259 -> 384 lane padding (zeros)
    p["cat_pad"] = nip - ni
    p["post_ps"] = _prep_conv(*conv_w(256, 256 * 4, 1, True))   # NormWeight -> bias
    wr1, br1 = conv_w(ni, ni, 3, True)           # res_block convs (NormSpectral -> bias)
    wr2, br2 = conv_w(ni, ni, 3, True)
    wf, bf = conv_w(ni, n_classes, 1, True)      # final 1x1 conv, no activ, bias
    p["rb1"] = _prep_conv(wr1, br1, cin_pad=nip, nout=nip)  # keep zero-padded lanes
    p["rb2"] = _prep_conv(wr2, br2, cin_pad=nip, nout=nip)
    p["final"] = _prep_conv(wf, bf, cin_pad=nip)
    return p


# ---------------------------------------------------------------------------
# Forward pass
# ---------------------------------------------------------------------------
def unet_block_wide(blk, up_in, s):
    # CustomPixelShuffle_ICNR: 1x1 conv (no bias) -> BN -> ReLU -> PixelShuffle(2)
    up = conv2d_fused(up_in, blk["shuf"], relu_post=True)
    up = pixel_shuffle(up, 2)
    if up.shape[1:3] != s.shape[1:3]:
        up = nearest_resize(up, s.shape[1:3])
    # relu(cat([up, bn(s)])) == cat([up, relu(bn(s))]) since up >= 0 already.
    bsc, bsh = blk["bn_s"]
    s_bn = jnp.maximum(s * bsc + bsh, 0.0)       # folded into the concat write
    parts = [up.astype(BF16), s_bn.astype(BF16)]
    if blk["cat_pad"]:
        parts.append(jnp.zeros(up.shape[:3] + (blk["cat_pad"],), BF16))
    cat = jnp.concatenate(parts, axis=-1)
    # custom_conv_layer: 3x3 conv (no bias) -> ReLU -> BN
    return conv2d_fused(cat, blk["conv"], relu_pre=True)


def deoldify_forward(p, x_nchw):
    x = jnp.transpose(x_nchw, (0, 2, 3, 1)).astype(F32)     # -> NHWC
    # ---- layers_enc (synthetic backbone -> [x1, x2, x3, x4, res]) ----
    feats = []
    h = x
    for cp in p["enc"]:
        h = conv2d_fused(h, cp, stride=2, relu_post=True)
        feats.append(h)
    x1, x2, x3, x4, res = feats
    # ---- layers_mid: BN(2048) -> ReLU -> middle_conv ----
    msc, msh = p["mid_bn"]
    res = affine_act(res, msc, msh, relu_post=True)
    for cp in p["mid"]:
        res = conv2d_fused(res, cp, relu_pre=True)
    # ---- layers_dec ----
    for blk, s in zip(p["dec"], [x4, x3, x2, x1]):
        res = unet_block_wide(blk, res, s)
    # ---- layers_post ----
    # idx 0: PixelShuffle_ICNR(256): 1x1 conv (bias) -> ReLU -> PixelShuffle(2)
    res = conv2d_fused(res, p["post_ps"], relu_post=True)
    res = pixel_shuffle(res, 2)
    # idx 1: MergeLayer(dense=True): concat with the network input (+ zero lanes)
    parts = [res, x]
    if p["cat_pad"]:
        parts.append(jnp.zeros(x.shape[:3] + (p["cat_pad"],), F32))
    res = jnp.concatenate(parts, axis=-1)
    skip = res
    # idx 2: res_block(259): (3x3 conv + bias -> ReLU) x2, skip add fused into rb2
    res = conv2d_fused(res, p["rb1"], relu_post=True)
    res = conv2d_fused(res, p["rb2"], relu_post=True, add=skip)
    # idx 3: custom_conv_layer(259, n_classes, ks=1, use_activ=False)
    res = conv2d_fused(res, p["final"])
    return jnp.transpose(res, (0, 3, 1, 2))                  # -> NCHW


if __name__ == "__main__":
    key = jax.random.PRNGKey(0)
    pkey, xkey = jax.random.split(key)
    params = build_params(pkey, n_classes=3)
    x = jax.random.normal(xkey, (2, 3, 64, 64), F32)          # NCHW, like PyTorch
    out = deoldify_forward(params, x)
    out = jax.block_until_ready(out)
    assert out.shape == (2, 3, 64, 64), out.shape
    assert out.dtype == jnp.float32
    print("KERNEL_OK")
</pallas_src>

<mosaic_0001>
module attributes {stable_mosaic.version = 11 : i64} {
  func.func @_mm_fused_kernel(%arg0: i32, %arg1: i32, %arg2: i32, %arg3: memref<512x128xbf16, #tpu.memory_space<vmem>>, %arg4: memref<128x128xbf16, #tpu.memory_space<vmem>>, %arg5: memref<1x128xf32, #tpu.memory_space<vmem>>, %arg6: memref<1x128xf32, #tpu.memory_space<vmem>>, %arg7: memref<1x128xf32, #tpu.memory_space<vmem>>, %arg8: memref<512x128xf32, #tpu.memory_space<vmem>>, %arg9: memref<512x128xf32, #tpu.memory_space<vmem>>) attributes {dimension_semantics = [#tpu.dimension_semantics<parallel>, #tpu.dimension_semantics<parallel>, #tpu.dimension_semantics<arbitrary>], iteration_bounds = array<i64: 4, 1, 1>, scalar_prefetch = 0 : i64, scratch_operands = 1 : i64, tpu.core_type = #tpu.core_type<tc>, window_params = [{transform_indices = @transform_0, window_bounds = array<i64: 512, 128>}, {transform_indices = @transform_1, window_bounds = array<i64: 128, 128>}, {transform_indices = @transform_2, window_bounds = array<i64: 1, 128>}, {transform_indices = @transform_3, window_bounds = array<i64: 1, 128>}, {transform_indices = @transform_4, window_bounds = array<i64: 1, 128>}, {transform_indices = @transform_5, window_bounds = array<i64: 512, 128>}]} {
    %c0_i32 = arith.constant 0 : i32
    %0 = arith.cmpi eq, %arg2, %c0_i32 : i32
    %1 = arith.extui %0 : i1 to i32
    %c0_i32_0 = arith.constant 0 : i32
    %2 = arith.cmpi ne, %1, %c0_i32_0 : i32
    scf.if %2 {
      %cst_10 = arith.constant 0.000000e+00 : f32
      %12 = vector.broadcast %cst_10 : f32 to vector<512x128xf32>
      %c0_11 = arith.constant 0 : index
      %c0_12 = arith.constant 0 : index
      %13 = vector.load %arg9[%c0_11, %c0_12] : memref<512x128xf32, #tpu.memory_space<vmem>>, vector<512x128xf32>
      tpu.vector_store %arg9[%c0_11, %c0_12], %12 {strides = array<i32>} : memref<512x128xf32, #tpu.memory_space<vmem>>, vector<512x128xf32>,
    } else {
    }
    %c0 = arith.constant 0 : index
    %c0_1 = arith.constant 0 : index
    %3 = vector.load %arg9[%c0, %c0_1] : memref<512x128xf32, #tpu.memory_space<vmem>>, vector<512x128xf32>
    %c0_2 = arith.constant 0 : index
    %c0_3 = arith.constant 0 : index
    %4 = vector.load %arg3[%c0_2, %c0_3] : memref<512x128xbf16, #tpu.memory_space<vmem>>, vector<512x128xbf16>
    %c0_4 = arith.constant 0 : index
    %c0_5 = arith.constant 0 : index
    %5 = vector.load %arg4[%c0_4, %c0_5] : memref<128x128xbf16, #tpu.memory_space<vmem>>, vector<128x128xbf16>
    %cst = arith.constant dense<0.000000e+00> : vector<512x128xf32>
    %6 = tpu.matmul %4, %5, %cst {dimension_numbers = #tpu.dot_dimension_numbers<[1], [0], [0], [1], [0, 0, 1, 1], [], []>} : vector<512x128xbf16>, vector<128x128xbf16>, vector<512x128xf32> -> vector<512x128xf32>
    %7 = arith.addf %3, %6 : vector<512x128xf32>
    %c0_6 = arith.constant 0 : index
    %c0_7 = arith.constant 0 : index
    %8 = vector.load %arg9[%c0_6, %c0_7] : memref<512x128xf32, #tpu.memory_space<vmem>>, vector<512x128xf32>
    tpu.vector_store %arg9[%c0_6, %c0_7], %7 {strides = array<i32>} : memref<512x128xf32, #tpu.memory_space<vmem>>, vector<512x128xf32>,
    %c0_i32_8 = arith.constant 0 : i32
    %9 = arith.cmpi eq, %arg2, %c0_i32_8 : i32
    %10 = arith.extui %9 : i1 to i32
    %c0_i32_9 = arith.constant 0 : i32
    %11 = arith.cmpi ne, %10, %c0_i32_9 : i32
    scf.if %11 {
      %c0_10 = arith.constant 0 : index
      %c0_11 = arith.constant 0 : index
      %12 = vector.load %arg9[%c0_10, %c0_11] : memref<512x128xf32, #tpu.memory_space<vmem>>, vector<512x128xf32>
      %c0_12 = arith.constant 0 : index
      %c0_13 = arith.constant 0 : index
      %13 = vector.load %arg5[%c0_12, %c0_13] : memref<1x128xf32, #tpu.memory_space<vmem>>, vector<1x128xf32>
      %14 = vector.broadcast %13 : vector<1x128xf32> to vector<512x128xf32>
      %15 = arith.addf %12, %14 : vector<512x128xf32>
      %c0_14 = arith.constant 0 : index
      %c0_15 = arith.constant 0 : index
      %16 = vector.load %arg6[%c0_14, %c0_15] : memref<1x128xf32, #tpu.memory_space<vmem>>, vector<1x128xf32>
      %17 = vector.broadcast %16 : vector<1x128xf32> to vector<512x128xf32>
      %18 = arith.mulf %15, %17 : vector<512x128xf32>
      %c0_16 = arith.constant 0 : index
      %c0_17 = arith.constant 0 : index
      %19 = vector.load %arg7[%c0_16, %c0_17] : memref<1x128xf32, #tpu.memory_space<vmem>>, vector<1x128xf32>
      %20 = vector.broadcast %19 : vector<1x128xf32> to vector<512x128xf32>
      %21 = arith.addf %18, %20 : vector<512x128xf32>
      %cst_18 = arith.constant 0.000000e+00 : f32
      %22 = vector.broadcast %cst_18 : f32 to vector<512x128xf32>
      %23 = arith.maximumf %21, %22 : vector<512x128xf32>
      %c0_19 = arith.constant 0 : index
      %c0_20 = arith.constant 0 : index
      %24 = vector.load %arg8[%c0_19, %c0_20] : memref<512x128xf32, #tpu.memory_space<vmem>>, vector<512x128xf32>
      tpu.vector_store %arg8[%c0_19, %c0_20], %23 {strides = array<i32>} : memref<512x128xf32, #tpu.memory_space<vmem>>, vector<512x128xf32>,
    } else {
    }
    return
  }
  func.func @transform_0(%arg0: i32, %arg1: i32, %arg2: i32) -> (i32, i32) {
    %c0_i32 = arith.constant 0 : i32
    return %arg0, %arg2 : i32, i32
  }
  func.func @transform_1(%arg0: i32, %arg1: i32, %arg2: i32) -> (i32, i32) {
    %c0_i32 = arith.constant 0 : i32
    return %arg2, %arg1 : i32, i32
  }
  func.func @transform_2(%arg0: i32, %arg1: i32, %arg2: i32) -> (i32, i32) {
    %c0_i32 = arith.constant 0 : i32
    %c0_i32_0 = arith.constant 0 : i32
    return %c0_i32, %arg1 : i32, i32
  }
  func.func @transform_3(%arg0: i32, %arg1: i32, %arg2: i32) -> (i32, i32) {
    %c0_i32 = arith.constant 0 : i32
    %c0_i32_0 = arith.constant 0 : i32
    return %c0_i32, %arg1 : i32, i32
  }
  func.func @transform_4(%arg0: i32, %arg1: i32, %arg2: i32) -> (i32, i32) {
    %c0_i32 = arith.constant 0 : i32
    %c0_i32_0 = arith.constant 0 : i32
    return %c0_i32, %arg1 : i32, i32
  }
  func.func @transform_5(%arg0: i32, %arg1: i32, %arg2: i32) -> (i32, i32) {
    %c0_i32 = arith.constant 0 : i32
    return %arg0, %arg1 : i32, i32
  }
}

</mosaic_0001>

<bundles_post_ra>
// kernel: tpu_custom_call.1
= control target key start
LH: loop header
LB: loop body
LE: loop exit
PB: predicated region body
PF: predicated region fallthrough
CT: control target
= control target key end

     0   :  { %s2616_s0 = inlined_call_operand.hbm [shape: bf16[2048,128], index: 0, kind: input, shape index: {}]   ;;  %s2617_s1 = inlined_call_operand.hbm [shape: bf16[128,128], index: 1, kind: input, shape index: {}]   ;;  %s2618_s2 = inlined_call_operand.vmem [shape: f32[1,128], index: 2, kind: input, shape index: {}]   ;;  %s2619_s3 = inlined_call_operand.vmem [shape: f32[1,128], index: 3, kind: input, shape index: {}]   ;;  %s2620_s4 = inlined_call_operand.vmem [shape: f32[1,128], index: 4, kind: input, shape index: {}]   ;;  %s2621_s5 = inlined_call_operand.hbm [shape: f32[2048,128], index: 5, kind: output, shape index: {}]  }
   0x1   :  { %2626 = sst [smem:[#allocation14_spill]] %s2617_s1 }
   0x2   :  { %10 = vsyncpa [#allocation4], 0 }
   0x3   :  { %12 = vsyncpa [#allocation4 + $0x1], 0 }
   0x4   :  { %13 = vsyncpa [#allocation7], 0 }
   0x5   :  { %14 = vsyncpa [#allocation5], 0 }
   0x6   :  { %16 = vsyncpa [#allocation5 + $0x1], 0  ;;  %s2154_s18 = smov 0   ;;  %s2156_s19 = smov 0  }
   0x7   :  { %s2158_s20 = smov 0   ;;  %s2160_s21 = smov 0  }
   0x8   :  { %s2162_s22 = smov 0   ;;  %s2164_s23 = smov 0  }
   0x9 LB: > { %s1645_s24 = sadd.s32 4294967295, %s2117_s23   ;;  %s1646_s25 = sadd.s32 4294967294, %s2117_s23   ;;  %s2117_s23 = sphi %s2164_s23, %s22_s23   ;;  %s2113_s22 = sphi %s2162_s22, %s2645_s22   ;;  %s2109_s21 = sphi %s2160_s21, %s2644_s21   ;;  %s2105_s20 = sphi %s2158_s20, %s2643_s20   ;;  %s2101_s19 = sphi %s2156_s19, %s2642_s19   ;;  %s2097_s18 = sphi %s2154_s18, %s2641_s18  }
   0xa   : > { %p63_p0 = scmp.ne.s32.totalorder %s2101_s19, %s2097_s18  ;;  %p2188_p1 = scmp.eq.s32.totalorder %s1645_s24, 0 }
   0xb   : > { %p2192_p2 = scmp.eq.s32.totalorder %s1645_s24, 3  ;;  %p201_p3 = scmp.eq.s32.totalorder %s1646_s25, 3 }
   0xc   : > { %p2198_p4 = por %p2188_p1, %p63_p0  ;;  %p1647_p5 = scmp.ge.s32.totalorder %s2117_s23, 1 }
   0xd   : > { %p2203_p6 = por %p201_p3, %p63_p0  ;;  %p208_p7 = scmp.lt.s32.totalorder %s2117_s23, 5 }
   0xe   : > { %s2632_s1 = sld [smem:[#allocation14_spill]]  ;;  %s2119_s9 = smov [#allocation6]  }
   0xf   : > { %s2630_s29 = scalar_select %p2203_p6, 1, 0 }
  0x10   : > { %p2211_p8 = pnand %p1647_p5, %p208_p7  ;;  %s225_s10 = sshll.u32 %s2119_s9, 4  ;;  %s226_s10 = int_to_ptr.vmem [resolvable:$true] %s225_s10 }
  0x11   : > { %2631 = sst [smem:[#allocation12_spill]] %s2630_s29  ;;  %s2622_s11 = smov 64  }
  0x12   : > { %p1899_p9 = pneg %p2211_p8  ;;  %s2623_s12 = smov 4  }
  0x13   : > { %s41_s13 = sadd.s32 1, %s2113_s22  ;;  %s50_s14 = sadd.s32 1, %s2105_s20 }
  0x14   : > { %s223_s7 = sshll.u32 %s2632_s1, 4  ;;  %p1900_p10 = pnand %p1899_p9, %p2188_p1  ;;  %s224_s7 = int_to_ptr.hbm [resolvable:$true] %s223_s7 }
  0x15   : > { %p43_p11 = scmp.ge.s32.totalorder %s41_s13, 4  ;;  %p57_p12 = scmp.ne.s32.totalorder %s2105_s20, %s2101_s19 }
  0x16   : > { %1902 = dma.hbm_to_vmem [thread:$0]  (!%p1900_p10), %s224_s7, 1024, %s226_s10, [#allocation7], %s2622_s11, %s2622_s11, %s2623_s12  }
  0x17   : > { %p58_p13 = scmp.eq.s32.totalorder %s2117_s23, 0  ;;  %s2647_s13 = smov (%p43_p11, %s41_s13), 0 }
  0x18   : > { %2634 = sst [smem:[#allocation13_spill]] %s2647_s13  ;;  %p2235_p3 = por %p2192_p2, %p57_p12 }
  0x19   : > { %p2229_p0 = por %p58_p13, %p57_p12  ;;  %s45_s17 = ssub.s32 %s2113_s22, %s2647_s13 }
  0x1a   : > { %p1912_p5 = scmp.lt.s32.totalorder %s2117_s23, 4  ;;  %p48_p7 = scmp.eq.s32.totalorder %s45_s17, 0 }
  0x1b   : > { %s257_s24 = sand.u32 1, %s2105_s20   ;;  %s1825_s6 = sshll.u32 %s2113_s22, 8 }
  0x1c   : > { %s1653_s25 = sshll.u32 %s257_s24, 8  ;;  %s267_s10 = scalar_lea.hbm %s2616_s0, %s1825_s6 }
  0x1d   : > { %s2244_s30 = scalar_select %p48_p7, %s2105_s20, %s50_s14  }
  0x1e   : > { %s261_s11 = scalar_lea.vmem [#allocation3], %s1653_s25  ;;  %s268_s27 = sshll.u32 %s267_s10, 4  ;;  %s269_s27 = int_to_ptr.hbm [resolvable:$true] %s268_s27 }
  0x1f   : > { %s270_s12 = sshll.u32 %s261_s11, 4  ;;  %p1904_p2 = pnand %p1912_p5, %p2229_p0  ;;  %s271_s12 = int_to_ptr.vmem [resolvable:$true] %s270_s12 }
  0x20   : > { %s258_s1 = scalar_lea.sflag [#allocation4], %s257_s24  ;;  %s2637_s13 = smov 4  }
  0x21   : > { %s2638_s29 = smov 64   ;;  %282 = sbr.rel (%p2211_p8) target bundleno = 339 (0x153), region = 40 }
  0x22   : > { %1906 = dma.hbm_to_vmem [thread:$0]  (!%p1904_p2), %s269_s27, 4096, %s271_s12, %s258_s1, %s2638_s29, %s2638_s29, %s2637_s13  }
  0x23   : > { %s2258_s14 = sand.u32 (!%p2211_p8), 1, %s2101_s19  }
  0x24   : > { %s1657_s11 = sshll.u32 (!%p2211_p8), %s2258_s14, 8  ;;  %s285_s17 = scalar_lea.sflag (!%p2211_p8), [#allocation4], %s2258_s14 }
  0x25   : > { %s2262_s25 = scalar_lea.vmem (!%p2211_p8), [#allocation3], %s1657_s11 }
  0x26   : > { %2084 = dma.done.wait (%p2198_p4), %s285_s17, 4096  }
  0x27   : > { %2086 = vsyncadd (%p2198_p4), %s285_s17, 4294963200 }
  0x28   : > { %2088 = dma.done.wait (%p2188_p1), [#allocation7], 1024  }
  0x29   : > { %2090 = vsyncadd (%p2188_p1), [#allocation7], 4294966272  ;;  %v1865_v0 = vld [vmem:[#allocation6 + $0x38] sm:$0xff]  ;;  %v1864_v1 = vld [vmem:[#allocation6 + $0x30] sm:$0xff]  ;;  %s1659_s13 = sshll.u32 %s2258_s14, 9  ;;  %s1866_s24 = sshll.u32 %s2109_s21, 9 }
  0x2a   : > { %794 = vmatpush.bf16.msra.mxu0 %v1865_v0  ;;  %1867 = vmatpush.bf16.msra.mxu1 %v1865_v0  ;;  %v1863_v2 = vld [vmem:[#allocation6 + $0x28] sm:$0xff]  ;;  %v1862_v3 = vld [vmem:[#allocation6 + $0x20] sm:$0xff]  ;;  %v1861_v4 = vld [vmem:[#allocation6 + $0x18] sm:$0xff]  ;;  %s2328_s15 = scalar_lea.vmem [#allocation8], %s1659_s13  ;;  %s1503_s9 = scalar_lea.hbm %s2621_s5, %s1866_s24 }
  0x2b   : > { %1868 = vmatpush.bf16.msra.mxu2 %v1865_v0  ;;  %1869 = vmatpush.bf16.msra.mxu3 %v1865_v0  ;;  %v1860_v5 = vld [vmem:[#allocation6 + $0x10] sm:$0xff]  ;;  %v1859_v6 = vld [vmem:[#allocation6 + $0x8] sm:$0xff]  ;;  %v1858_v7 = vld [vmem:[#allocation6] sm:$0xff]  ;;  %s1504_s21 = sshll.u32 %s2328_s15, 4  ;;  %s1506_s10 = sshll.u32 %s1503_s9, 4  ;;  %s1505_s21 = int_to_ptr.vmem [resolvable:$true] %s1504_s21  ;;  %s1507_s10 = int_to_ptr.hbm [resolvable:$true] %s1506_s10 }
  0x2c   : > { %v1826_v8 = vld [vmem:[%s2262_s25] sm:$0xff]  ;;  %v1827_v12 = vld [vmem:[%s2262_s25 + $0x8] sm:$0xff]  ;;  %v1828_v16 = vld [vmem:[%s2262_s25 + $0x10] sm:$0xff]  ;;  %s1491_s27 = scalar_lea.sflag [#allocation5], %s2258_s14  ;;  %s2045_s11 = sshra.s32 %s1507_s10, 4  ;;  %s2046_s11 = int_to_ptr.hbm [resolvable:$true] %s2045_s11 }
  0x2d   : > { %v1834_v9 = vld [vmem:[%s2262_s25 + $0x40] sm:$0xff]  ;;  %v1835_v13 = vld [vmem:[%s2262_s25 + $0x48] sm:$0xff]  ;;  %v1836_v17 = vld [vmem:[%s2262_s25 + $0x50] sm:$0xff]  ;;  %s2047_s17 = scalar_lea.hbm %s2046_s11, 512  ;;  %s2051_s26 = scalar_lea.hbm %s2621_s5, 2048 }
  0x2e   : > { %795 = vmatpush.bf16.msra.mxu0 %v1864_v1  ;;  %1870 = vmatpush.bf16.msra.mxu1 %v1864_v1  ;;  %v1842_v10 = vld [vmem:[%s2262_s25 + $0x80] sm:$0xff]  ;;  %v1843_v14 = vld [vmem:[%s2262_s25 + $0x88] sm:$0xff]  ;;  %v1844_v18 = vld [vmem:[%s2262_s25 + $0x90] sm:$0xff]  ;;  %p2048_p1 = scmp.ne.s32.totalorder %s2046_s11, %s2047_s17  ;;  %p2052_p9 = scmp.lt.s32.totalorder %s2046_s11, %s2621_s5 }
  0x2f   : > { %1871 = vmatpush.bf16.msra.mxu2 %v1864_v1  ;;  %1872 = vmatpush.bf16.msra.mxu3 %v1864_v1  ;;  %v1850_v11 = vld [vmem:[%s2262_s25 + $0xc0] sm:$0xff]  ;;  %v1851_v15 = vld [vmem:[%s2262_s25 + $0xc8] sm:$0xff]  ;;  %v1852_v19 = vld [vmem:[%s2262_s25 + $0xd0] sm:$0xff]  ;;  %p2053_p10 = scmp.lt.s32.totalorder %s2051_s26, %s2047_s17 }
  0x30   : > { %v1829_v20 = vld [vmem:[%s2262_s25 + $0x18] sm:$0xff]  ;;  %v1830_v24 = vld [vmem:[%s2262_s25 + $0x20] sm:$0xff]  ;;  %v1831_v28 = vld [vmem:[%s2262_s25 + $0x28] sm:$0xff]  ;;  %p2049_p4 = pnand %p2048_p1, %p2235_p3 }
  0x31   : > { %v1837_v21 = vld [vmem:[%s2262_s25 + $0x58] sm:$0xff]  ;;  %v1838_v25 = vld [vmem:[%s2262_s25 + $0x60] sm:$0xff]  ;;  %v1839_v29 = vld [vmem:[%s2262_s25 + $0x68] sm:$0xff]  ;;  %p2054_p11 = por %p2053_p10, %p2052_p9 }
  0x32   : > { %796 = vmatpush.bf16.msra.mxu0 %v1863_v2  ;;  %1873 = vmatpush.bf16.msra.mxu1 %v1863_v2  ;;  %v1845_v22 = vld [vmem:[%s2262_s25 + $0x98] sm:$0xff]  ;;  %v1846_v26 = vld [vmem:[%s2262_s25 + $0xa0] sm:$0xff]  ;;  %v1847_v30 = vld [vmem:[%s2262_s25 + $0xa8] sm:$0xff]  ;;  %p2050_p8 = pneg %p2049_p4 }
  0x33   : > { %1874 = vmatpush.bf16.msra.mxu2 %v1863_v2  ;;  %1875 = vmatpush.bf16.msra.mxu3 %v1863_v2  ;;  %v1853_v23 = vld [vmem:[%s2262_s25 + $0xd8] sm:$0xff]  ;;  %v1854_v27 = vld [vmem:[%s2262_s25 + $0xe0] sm:$0xff]  ;;  %v1855_v31 = vld [vmem:[%s2262_s25 + $0xe8] sm:$0xff] }
  0x34   : > { %v1832_v32 = vld [vmem:[%s2262_s25 + $0x30] sm:$0xff]  ;;  %v1833_v36 = vld [vmem:[%s2262_s25 + $0x38] sm:$0xff]  ;;  %v2307_v40 = vld [vmem:[%s2618_s2] ss:$0 sm:$0xff]  ;;  %p2055_p12 = pnand %p2054_p11, %p2050_p8 }
  0x35   : > { %v1840_v33 = vld [vmem:[%s2262_s25 + $0x70] sm:$0xff]  ;;  %v1841_v37 = vld [vmem:[%s2262_s25 + $0x78] sm:$0xff]  ;;  %v2312_v41 = vld [vmem:[%s2619_s3] ss:$0 sm:$0xff] }
  0x36   : > { %797 = vmatpush.bf16.msra.mxu0 %v1862_v3  ;;  %1876 = vmatpush.bf16.msra.mxu1 %v1862_v3  ;;  %v1848_v34 = vld [vmem:[%s2262_s25 + $0xb0] sm:$0xff]  ;;  %v1849_v38 = vld [vmem:[%s2262_s25 + $0xb8] sm:$0xff]  ;;  %v2318_v45 = vld [vmem:[%s2620_s4] ss:$0 sm:$0xff] }
  0x37   : > { %1877 = vmatpush.bf16.msra.mxu2 %v1862_v3  ;;  %1878 = vmatpush.bf16.msra.mxu3 %v1862_v3  ;;  %v1856_v35 = vld [vmem:[%s2262_s25 + $0xf0] sm:$0xff]  ;;  %v1857_v39 = vld [vmem:[%s2262_s25 + $0xf8] sm:$0xff] }
  0x3a   : > { %798 = vmatpush.bf16.msra.mxu0 %v1861_v4  ;;  %1879 = vmatpush.bf16.msra.mxu1 %v1861_v4 }
  0x3b   : > { %1880 = vmatpush.bf16.msra.mxu2 %v1861_v4  ;;  %1881 = vmatpush.bf16.msra.mxu3 %v1861_v4 }
  0x3e   : > { %799 = vmatpush.bf16.msra.mxu0 %v1860_v5  ;;  %1882 = vmatpush.bf16.msra.mxu1 %v1860_v5 }
  0x3f   : > { %1883 = vmatpush.bf16.msra.mxu2 %v1860_v5  ;;  %1884 = vmatpush.bf16.msra.mxu3 %v1860_v5 }
  0x42   : > { %800 = vmatpush.bf16.msra.mxu0 %v1859_v6  ;;  %1885 = vmatpush.bf16.msra.mxu1 %v1859_v6 }
  0x43   : > { %1886 = vmatpush.bf16.msra.mxu2 %v1859_v6  ;;  %1887 = vmatpush.bf16.msra.mxu3 %v1859_v6 }
  0x46   : > { %801 = vmatpush.bf16.msra.mxu0 %v1858_v7  ;;  %1888 = vmatpush.bf16.msra.mxu1 %v1858_v7 }
  0x47   : > { %1889 = vmatpush.bf16.msra.mxu2 %v1858_v7  ;;  %1890 = vmatpush.bf16.msra.mxu3 %v1858_v7 }
  0x49   : > { %802 = vmatmul.bf16.vlgmr.msra.gmra.mxu0 %v1826_v8  ;;  %842 = vmatmul.bf16.vlgmr.msra.gmra.mxu1 %v1834_v9 }
  0x4a   : > { %882 = vmatmul.bf16.vlgmr.msra.gmra.mxu2 %v1842_v10  ;;  %922 = vmatmul.bf16.vlgmr.msra.gmra.mxu3 %v1850_v11 }
  0x59   : > { %807 = vmatmul.bf16.gmra.mxu0 %v1827_v12  ;;  %847 = vmatmul.bf16.gmra.mxu1 %v1835_v13 }
  0x5a   : > { %887 = vmatmul.bf16.gmra.mxu2 %v1843_v14  ;;  %927 = vmatmul.bf16.gmra.mxu3 %v1851_v15 }
  0x69   : > { %812 = vmatmul.bf16.gmra.mxu0 %v1828_v16  ;;  %852 = vmatmul.bf16.gmra.mxu1 %v1836_v17 }
  0x6a   : > { %892 = vmatmul.bf16.gmra.mxu2 %v1844_v18  ;;  %932 = vmatmul.bf16.gmra.mxu3 %v1852_v19 }
  0x79   : > { %817 = vmatmul.bf16.gmra.mxu0 %v1829_v20  ;;  %857 = vmatmul.bf16.gmra.mxu1 %v1837_v21 }
  0x7a   : > { %897 = vmatmul.bf16.gmra.mxu2 %v1845_v22  ;;  %937 = vmatmul.bf16.gmra.mxu3 %v1853_v23 }
  0x89   : > { %822 = vmatmul.bf16.gmra.mxu0 %v1830_v24  ;;  %862 = vmatmul.bf16.gmra.mxu1 %v1838_v25 }
  0x8a   : > { %902 = vmatmul.bf16.gmra.mxu2 %v1846_v26  ;;  %942 = vmatmul.bf16.gmra.mxu3 %v1854_v27 }
  0x99   : > { %827 = vmatmul.bf16.gmra.mxu0 %v1831_v28  ;;  %867 = vmatmul.bf16.gmra.mxu1 %v1839_v29 }
  0x9a   : > { %907 = vmatmul.bf16.gmra.mxu2 %v1847_v30  ;;  %947 = vmatmul.bf16.gmra.mxu3 %v1855_v31 }
  0xa9   : > { %832 = vmatmul.bf16.gmra.mxu0 %v1832_v32  ;;  %872 = vmatmul.bf16.gmra.mxu1 %v1840_v33 }
  0xaa   : > { %912 = vmatmul.bf16.gmra.mxu2 %v1848_v34  ;;  %952 = vmatmul.bf16.gmra.mxu3 %v1856_v35 }
  0xb9   : > { %837 = vmatmul.bf16.gmra.mxu0 %v1833_v36  ;;  %877 = vmatmul.bf16.gmra.mxu1 %v1841_v37 }
  0xba   : > { %917 = vmatmul.bf16.gmra.mxu2 %v1849_v38  ;;  %957 = vmatmul.bf16.gmra.mxu3 %v1857_v39 }
  0xc6   : > { %v803_v42 = vpop.f32.mrf.mxu0  ;;  %v843_v43 = vpop.f32.mrf.mxu1 }
  0xc7   : > { %v1162_v44 = vadd.f32 %v2307_v40, %v803_v42  ;;  %v1178_v46 = vadd.f32 %v2307_v40, %v843_v43 }
  0xc9   : > { %v1230_v47 = vmul.f32 %v2312_v41, %v1162_v44  ;;  %v1246_v48 = vmul.f32 %v2312_v41, %v1178_v46 }
  0xcb   : > { %v1298_v49 = vadd.f32 %v2318_v45, %v1230_v47  ;;  %v1314_v50 = vadd.f32 %v2318_v45, %v1246_v48 }
  0xcd   : > { %v1362_v51 = vmax.f32 %v1298_v49, 0.0  ;;  %v1378_v52 = vmax.f32 %v1314_v50, 0.0  ;;  %v883_v53 = vpop.f32.mrf.mxu2  ;;  %v923_v54 = vpop.f32.mrf.mxu3 }
  0xce   : > { %v1194_v55 = vadd.f32 %v2307_v40, %v883_v53  ;;  %v1210_v56 = vadd.f32 %v2307_v40, %v923_v54  ;;  %v805_v57 = vpop.f32.mrf.mxu0  ;;  %v845_v58 = vpop.f32.mrf.mxu1 }
  0xcf   : > { %1426 = vst [vmem:[%s2328_s15] sm:$0xff] %v1362_v51  ;;  %v1163_v59 = vadd.f32 %v2307_v40, %v805_v57  ;;  %v1179_v60 = vadd.f32 %v2307_v40, %v845_v58 }
  0xd0   : > { %1442 = vst [vmem:[%s2328_s15 + $0x80] sm:$0xff] %v1378_v52  ;;  %v1262_v61 = vmul.f32 %v2312_v41, %v1194_v55  ;;  %v1278_v62 = vmul.f32 %v2312_v41, %v1210_v56 }
  0xd1   : > { %v1231_v63 = vmul.f32 %v2312_v41, %v1163_v59  ;;  %v1247_v0 = vmul.f32 %v2312_v41, %v1179_v60 }
  0xd2   : > { %v1330_v1 = vadd.f32 %v2318_v45, %v1262_v61  ;;  %v1346_v2 = vadd.f32 %v2318_v45, %v1278_v62 }
  0xd3   : > { %v1299_v3 = vadd.f32 %v2318_v45, %v1231_v63  ;;  %v1315_v4 = vadd.f32 %v2318_v45, %v1247_v0 }
  0xd4   : > { %v1394_v5 = vmax.f32 %v1330_v1, 0.0  ;;  %v1410_v6 = vmax.f32 %v1346_v2, 0.0 }
  0xd5   : > { %v1363_v7 = vmax.f32 %v1299_v3, 0.0  ;;  %v1379_v8 = vmax.f32 %v1315_v4, 0.0  ;;  %v885_v9 = vpop.f32.mrf.mxu2  ;;  %v925_v10 = vpop.f32.mrf.mxu3 }
  0xd6   : > { %1458 = vst [vmem:[%s2328_s15 + $0x100] sm:$0xff] %v1394_v5  ;;  %v1195_v11 = vadd.f32 %v2307_v40, %v885_v9  ;;  %v1211_v12 = vadd.f32 %v2307_v40, %v925_v10  ;;  %v808_v13 = vpop.f32.mrf.mxu0  ;;  %v848_v14 = vpop.f32.mrf.mxu1 }
  0xd7   : > { %1474 = vst [vmem:[%s2328_s15 + $0x180] sm:$0xff] %v1410_v6  ;;  %v1164_v15 = vadd.f32 %v2307_v40, %v808_v13  ;;  %v1180_v16 = vadd.f32 %v2307_v40, %v848_v14 }
  0xd8   : > { %1427 = vst [vmem:[%s2328_s15 + $0x8] sm:$0xff] %v1363_v7  ;;  %v1263_v17 = vmul.f32 %v2312_v41, %v1195_v11  ;;  %v1279_v18 = vmul.f32 %v2312_v41, %v1211_v12 }
  0xd9   : > { %1443 = vst [vmem:[%s2328_s15 + $0x88] sm:$0xff] %v1379_v8  ;;  %v1232_v19 = vmul.f32 %v2312_v41, %v1164_v15  ;;  %v1248_v20 = vmul.f32 %v2312_v41, %v1180_v16 }
  0xda   : > { %v1331_v21 = vadd.f32 %v2318_v45, %v1263_v17  ;;  %v1347_v22 = vadd.f32 %v2318_v45, %v1279_v18 }
  0xdb   : > { %v1300_v23 = vadd.f32 %v2318_v45, %v1232_v19  ;;  %v1316_v24 = vadd.f32 %v2318_v45, %v1248_v20 }
  0xdc   : > { %v1395_v25 = vmax.f32 %v1331_v21, 0.0  ;;  %v1411_v26 = vmax.f32 %v1347_v22, 0.0 }
  0xdd   : > { %v1364_v27 = vmax.f32 %v1300_v23, 0.0  ;;  %v1380_v28 = vmax.f32 %v1316_v24, 0.0  ;;  %v888_v29 = vpop.f32.mrf.mxu2  ;;  %v928_v30 = vpop.f32.mrf.mxu3 }
  0xde   : > { %1459 = vst [vmem:[%s2328_s15 + $0x108] sm:$0xff] %v1395_v25  ;;  %v1196_v31 = vadd.f32 %v2307_v40, %v888_v29  ;;  %v1212_v32 = vadd.f32 %v2307_v40, %v928_v30  ;;  %v810_v33 = vpop.f32.mrf.mxu0  ;;  %v850_v34 = vpop.f32.mrf.mxu1 }
  0xdf   : > { %1475 = vst [vmem:[%s2328_s15 + $0x188] sm:$0xff] %v1411_v26  ;;  %v1165_v35 = vadd.f32 %v2307_v40, %v810_v33  ;;  %v1181_v36 = vadd.f32 %v2307_v40, %v850_v34 }
  0xe0   : > { %1428 = vst [vmem:[%s2328_s15 + $0x10] sm:$0xff] %v1364_v27  ;;  %v1264_v37 = vmul.f32 %v2312_v41, %v1196_v31  ;;  %v1280_v38 = vmul.f32 %v2312_v41, %v1212_v32 }
  0xe1   : > { %1444 = vst [vmem:[%s2328_s15 + $0x90] sm:$0xff] %v1380_v28  ;;  %v1233_v39 = vmul.f32 %v2312_v41, %v1165_v35  ;;  %v1249_v42 = vmul.f32 %v2312_v41, %v1181_v36 }
  0xe2   : > { %v1332_v43 = vadd.f32 %v2318_v45, %v1264_v37  ;;  %v1348_v44 = vadd.f32 %v2318_v45, %v1280_v38 }
  0xe3   : > { %v1301_v46 = vadd.f32 %v2318_v45, %v1233_v39  ;;  %v1317_v47 = vadd.f32 %v2318_v45, %v1249_v42 }
  0xe4   : > { %v1396_v48 = vmax.f32 %v1332_v43, 0.0  ;;  %v1412_v49 = vmax.f32 %v1348_v44, 0.0 }
  0xe5   : > { %v1365_v50 = vmax.f32 %v1301_v46, 0.0  ;;  %v1381_v51 = vmax.f32 %v1317_v47, 0.0  ;;  %v890_v52 = vpop.f32.mrf.mxu2  ;;  %v930_v53 = vpop.f32.mrf.mxu3 }
  0xe6   : > { %1460 = vst [vmem:[%s2328_s15 + $0x110] sm:$0xff] %v1396_v48  ;;  %v1197_v54 = vadd.f32 %v2307_v40, %v890_v52  ;;  %v1213_v55 = vadd.f32 %v2307_v40, %v930_v53  ;;  %v813_v56 = vpop.f32.mrf.mxu0  ;;  %v853_v57 = vpop.f32.mrf.mxu1 }
  0xe7   : > { %1476 = vst [vmem:[%s2328_s15 + $0x190] sm:$0xff] %v1412_v49  ;;  %v1166_v58 = vadd.f32 %v2307_v40, %v813_v56  ;;  %v1182_v59 = vadd.f32 %v2307_v40, %v853_v57 }
  0xe8   : > { %1429 = vst [vmem:[%s2328_s15 + $0x18] sm:$0xff] %v1365_v50  ;;  %v1265_v60 = vmul.f32 %v2312_v41, %v1197_v54  ;;  %v1281_v61 = vmul.f32 %v2312_v41, %v1213_v55 }
  0xe9   : > { %1445 = vst [vmem:[%s2328_s15 + $0x98] sm:$0xff] %v1381_v51  ;;  %v1234_v62 = vmul.f32 %v2312_v41, %v1166_v58  ;;  %v1250_v63 = vmul.f32 %v2312_v41, %v1182_v59 }
  0xea   : > { %v1333_v0 = vadd.f32 %v2318_v45, %v1265_v60  ;;  %v1349_v1 = vadd.f32 %v2318_v45, %v1281_v61 }
  0xeb   : > { %v1302_v2 = vadd.f32 %v2318_v45, %v1234_v62  ;;  %v1318_v3 = vadd.f32 %v2318_v45, %v1250_v63 }
  0xec   : > { %v1397_v4 = vmax.f32 %v1333_v0, 0.0  ;;  %v1413_v5 = vmax.f32 %v1349_v1, 0.0 }
  0xed   : > { %v1366_v6 = vmax.f32 %v1302_v2, 0.0  ;;  %v1382_v7 = vmax.f32 %v1318_v3, 0.0  ;;  %v893_v8 = vpop.f32.mrf.mxu2  ;;  %v933_v9 = vpop.f32.mrf.mxu3 }
  0xee   : > { %1461 = vst [vmem:[%s2328_s15 + $0x118] sm:$0xff] %v1397_v4  ;;  %v1198_v10 = vadd.f32 %v2307_v40, %v893_v8  ;;  %v1214_v11 = vadd.f32 %v2307_v40, %v933_v9  ;;  %v815_v12 = vpop.f32.mrf.mxu0  ;;  %v855_v13 = vpop.f32.mrf.mxu1 }
  0xef   : > { %1477 = vst [vmem:[%s2328_s15 + $0x198] sm:$0xff] %v1413_v5  ;;  %v1167_v14 = vadd.f32 %v2307_v40, %v815_v12  ;;  %v1183_v15 = vadd.f32 %v2307_v40, %v855_v13 }
  0xf0   : > { %1430 = vst [vmem:[%s2328_s15 + $0x20] sm:$0xff] %v1366_v6  ;;  %v1266_v16 = vmul.f32 %v2312_v41, %v1198_v10  ;;  %v1282_v17 = vmul.f32 %v2312_v41, %v1214_v11 }
  0xf1   : > { %1446 = vst [vmem:[%s2328_s15 + $0xa0] sm:$0xff] %v1382_v7  ;;  %v1235_v18 = vmul.f32 %v2312_v41, %v1167_v14  ;;  %v1251_v19 = vmul.f32 %v2312_v41, %v1183_v15 }
  0xf2   : > { %v1334_v20 = vadd.f32 %v2318_v45, %v1266_v16  ;;  %v1350_v21 = vadd.f32 %v2318_v45, %v1282_v17 }
  0xf3   : > { %v1303_v22 = vadd.f32 %v2318_v45, %v1235_v18  ;;  %v1319_v23 = vadd.f32 %v2318_v45, %v1251_v19 }
  0xf4   : > { %v1398_v24 = vmax.f32 %v1334_v20, 0.0  ;;  %v1414_v25 = vmax.f32 %v1350_v21, 0.0 }
  0xf5   : > { %v1367_v26 = vmax.f32 %v1303_v22, 0.0  ;;  %v1383_v27 = vmax.f32 %v1319_v23, 0.0  ;;  %v895_v28 = vpop.f32.mrf.mxu2  ;;  %v935_v29 = vpop.f32.mrf.mxu3 }
  0xf6   : > { %1462 = vst [vmem:[%s2328_s15 + $0x120] sm:$0xff] %v1398_v24  ;;  %v1199_v30 = vadd.f32 %v2307_v40, %v895_v28  ;;  %v1215_v31 = vadd.f32 %v2307_v40, %v935_v29  ;;  %v818_v32 = vpop.f32.mrf.mxu0  ;;  %v858_v33 = vpop.f32.mrf.mxu1 }
  0xf7   : > { %1478 = vst [vmem:[%s2328_s15 + $0x1a0] sm:$0xff] %v1414_v25  ;;  %v1168_v34 = vadd.f32 %v2307_v40, %v818_v32  ;;  %v1184_v35 = vadd.f32 %v2307_v40, %v858_v33 }
  0xf8   : > { %1431 = vst [vmem:[%s2328_s15 + $0x28] sm:$0xff] %v1367_v26  ;;  %v1267_v36 = vmul.f32 %v2312_v41, %v1199_v30  ;;  %v1283_v37 = vmul.f32 %v2312_v41, %v1215_v31 }
  0xf9   : > { %1447 = vst [vmem:[%s2328_s15 + $0xa8] sm:$0xff] %v1383_v27  ;;  %v1236_v38 = vmul.f32 %v2312_v41, %v1168_v34  ;;  %v1252_v39 = vmul.f32 %v2312_v41, %v1184_v35 }
  0xfa   : > { %v1335_v42 = vadd.f32 %v2318_v45, %v1267_v36  ;;  %v1351_v43 = vadd.f32 %v2318_v45, %v1283_v37 }
  0xfb   : > { %v1304_v44 = vadd.f32 %v2318_v45, %v1236_v38  ;;  %v1320_v46 = vadd.f32 %v2318_v45, %v1252_v39 }
  0xfc   : > { %v1399_v47 = vmax.f32 %v1335_v42, 0.0  ;;  %v1415_v48 = vmax.f32 %v1351_v43, 0.0 }
  0xfd   : > { %v1368_v49 = vmax.f32 %v1304_v44, 0.0  ;;  %v1384_v50 = vmax.f32 %v1320_v46, 0.0  ;;  %v898_v51 = vpop.f32.mrf.mxu2  ;;  %v938_v52 = vpop.f32.mrf.mxu3 }
  0xfe   : > { %1463 = vst [vmem:[%s2328_s15 + $0x128] sm:$0xff] %v1399_v47  ;;  %v1200_v53 = vadd.f32 %v2307_v40, %v898_v51  ;;  %v1216_v54 = vadd.f32 %v2307_v40, %v938_v52  ;;  %v820_v55 = vpop.f32.mrf.mxu0  ;;  %v860_v56 = vpop.f32.mrf.mxu1 }
  0xff   : > { %1479 = vst [vmem:[%s2328_s15 + $0x1a8] sm:$0xff] %v1415_v48  ;;  %v1169_v57 = vadd.f32 %v2307_v40, %v820_v55  ;;  %v1185_v58 = vadd.f32 %v2307_v40, %v860_v56 }
 0x100   : > { %1432 = vst [vmem:[%s2328_s15 + $0x30] sm:$0xff] %v1368_v49  ;;  %v1268_v59 = vmul.f32 %v2312_v41, %v1200_v53  ;;  %v1284_v60 = vmul.f32 %v2312_v41, %v1216_v54 }
 0x101   : > { %1448 = vst [vmem:[%s2328_s15 + $0xb0] sm:$0xff] %v1384_v50  ;;  %v1237_v61 = vmul.f32 %v2312_v41, %v1169_v57  ;;  %v1253_v62 = vmul.f32 %v2312_v41, %v1185_v58 }
 0x102   : > { %v1336_v63 = vadd.f32 %v2318_v45, %v1268_v59  ;;  %v1352_v0 = vadd.f32 %v2318_v45, %v1284_v60 }
 0x103   : > { %v1305_v1 = vadd.f32 %v2318_v45, %v1237_v61  ;;  %v1321_v2 = vadd.f32 %v2318_v45, %v1253_v62 }
 0x104   : > { %v1400_v3 = vmax.f32 %v1336_v63, 0.0  ;;  %v1416_v4 = vmax.f32 %v1352_v0, 0.0 }
 0x105   : > { %v1369_v5 = vmax.f32 %v1305_v1, 0.0  ;;  %v1385_v6 = vmax.f32 %v1321_v2, 0.0  ;;  %v900_v7 = vpop.f32.mrf.mxu2  ;;  %v940_v8 = vpop.f32.mrf.mxu3 }
 0x106   : > { %1464 = vst [vmem:[%s2328_s15 + $0x130] sm:$0xff] %v1400_v3  ;;  %v1201_v9 = vadd.f32 %v2307_v40, %v900_v7  ;;  %v1217_v10 = vadd.f32 %v2307_v40, %v940_v8  ;;  %v823_v11 = vpop.f32.mrf.mxu0  ;;  %v863_v12 = vpop.f32.mrf.mxu1 }
 0x107   : > { %1480 = vst [vmem:[%s2328_s15 + $0x1b0] sm:$0xff] %v1416_v4  ;;  %v1170_v13 = vadd.f32 %v2307_v40, %v823_v11  ;;  %v1186_v14 = vadd.f32 %v2307_v40, %v863_v12 }
 0x108   : > { %1433 = vst [vmem:[%s2328_s15 + $0x38] sm:$0xff] %v1369_v5  ;;  %v1269_v15 = vmul.f32 %v2312_v41, %v1201_v9  ;;  %v1285_v16 = vmul.f32 %v2312_v41, %v1217_v10 }
 0x109   : > { %1449 = vst [vmem:[%s2328_s15 + $0xb8] sm:$0xff] %v1385_v6  ;;  %v1238_v17 = vmul.f32 %v2312_v41, %v1170_v13  ;;  %v1254_v18 = vmul.f32 %v2312_v41, %v1186_v14 }
 0x10a   : > { %v1337_v19 = vadd.f32 %v2318_v45, %v1269_v15  ;;  %v1353_v20 = vadd.f32 %v2318_v45, %v1285_v16 }
 0x10b   : > { %v1306_v21 = vadd.f32 %v2318_v45, %v1238_v17  ;;  %v1322_v22 = vadd.f32 %v2318_v45, %v1254_v18 }
 0x10c   : > { %v1401_v23 = vmax.f32 %v1337_v19, 0.0  ;;  %v1417_v24 = vmax.f32 %v1353_v20, 0.0 }
 0x10d   : > { %v1370_v25 = vmax.f32 %v1306_v21, 0.0  ;;  %v1386_v26 = vmax.f32 %v1322_v22, 0.0  ;;  %v903_v27 = vpop.f32.mrf.mxu2  ;;  %v943_v28 = vpop.f32.mrf.mxu3 }
 0x10e   : > { %1465 = vst [vmem:[%s2328_s15 + $0x138] sm:$0xff] %v1401_v23  ;;  %v1202_v29 = vadd.f32 %v2307_v40, %v903_v27  ;;  %v1218_v30 = vadd.f32 %v2307_v40, %v943_v28  ;;  %v825_v31 = vpop.f32.mrf.mxu0  ;;  %v865_v32 = vpop.f32.mrf.mxu1 }
 0x10f   : > { %1481 = vst [vmem:[%s2328_s15 + $0x1b8] sm:$0xff] %v1417_v24  ;;  %v1171_v33 = vadd.f32 %v2307_v40, %v825_v31  ;;  %v1187_v34 = vadd.f32 %v2307_v40, %v865_v32 }
 0x110   : > { %1434 = vst [vmem:[%s2328_s15 + $0x40] sm:$0xff] %v1370_v25  ;;  %v1270_v35 = vmul.f32 %v2312_v41, %v1202_v29  ;;  %v1286_v36 = vmul.f32 %v2312_v41, %v1218_v30 }
 0x111   : > { %1450 = vst [vmem:[%s2328_s15 + $0xc0] sm:$0xff] %v1386_v26  ;;  %v1239_v37 = vmul.f32 %v2312_v41, %v1171_v33  ;;  %v1255_v38 = vmul.f32 %v2312_v41, %v1187_v34 }
 0x112   : > { %v1338_v39 = vadd.f32 %v2318_v45, %v1270_v35  ;;  %v1354_v42 = vadd.f32 %v2318_v45, %v1286_v36 }
 0x113   : > { %v1307_v43 = vadd.f32 %v2318_v45, %v1239_v37  ;;  %v1323_v44 = vadd.f32 %v2318_v45, %v1255_v38 }
 0x114   : > { %v1402_v46 = vmax.f32 %v1338_v39, 0.0  ;;  %v1418_v47 = vmax.f32 %v1354_v42, 0.0 }
 0x115   : > { %v1371_v48 = vmax.f32 %v1307_v43, 0.0  ;;  %v1387_v49 = vmax.f32 %v1323_v44, 0.0  ;;  %v905_v50 = vpop.f32.mrf.mxu2  ;;  %v945_v51 = vpop.f32.mrf.mxu3 }
 0x116   : > { %1466 = vst [vmem:[%s2328_s15 + $0x140] sm:$0xff] %v1402_v46  ;;  %v1203_v52 = vadd.f32 %v2307_v40, %v905_v50  ;;  %v1219_v53 = vadd.f32 %v2307_v40, %v945_v51  ;;  %v828_v54 = vpop.f32.mrf.mxu0  ;;  %v868_v55 = vpop.f32.mrf.mxu1 }
 0x117   : > { %1482 = vst [vmem:[%s2328_s15 + $0x1c0] sm:$0xff] %v1418_v47  ;;  %v1172_v56 = vadd.f32 %v2307_v40, %v828_v54  ;;  %v1188_v57 = vadd.f32 %v2307_v40, %v868_v55 }
 0x118   : > { %1435 = vst [vmem:[%s2328_s15 + $0x48] sm:$0xff] %v1371_v48  ;;  %v1271_v58 = vmul.f32 %v2312_v41, %v1203_v52  ;;  %v1287_v59 = vmul.f32 %v2312_v41, %v1219_v53 }
 0x119   : > { %1451 = vst [vmem:[%s2328_s15 + $0xc8] sm:$0xff] %v1387_v49  ;;  %v1240_v60 = vmul.f32 %v2312_v41, %v1172_v56  ;;  %v1256_v61 = vmul.f32 %v2312_v41, %v1188_v57 }
 0x11a   : > { %v1339_v62 = vadd.f32 %v2318_v45, %v1271_v58  ;;  %v1355_v63 = vadd.f32 %v2318_v45, %v1287_v59 }
 0x11b   : > { %v1308_v0 = vadd.f32 %v2318_v45, %v1240_v60  ;;  %v1324_v1 = vadd.f32 %v2318_v45, %v1256_v61 }
 0x11c   : > { %v1403_v2 = vmax.f32 %v1339_v62, 0.0  ;;  %v1419_v3 = vmax.f32 %v1355_v63, 0.0 }
 0x11d   : > { %v1372_v4 = vmax.f32 %v1308_v0, 0.0  ;;  %v1388_v5 = vmax.f32 %v1324_v1, 0.0  ;;  %v908_v6 = vpop.f32.mrf.mxu2  ;;  %v948_v7 = vpop.f32.mrf.mxu3 }
 0x11e   : > { %1467 = vst [vmem:[%s2328_s15 + $0x148] sm:$0xff] %v1403_v2  ;;  %v1204_v8 = vadd.f32 %v2307_v40, %v908_v6  ;;  %v1220_v9 = vadd.f32 %v2307_v40, %v948_v7  ;;  %v830_v10 = vpop.f32.mrf.mxu0  ;;  %v870_v11 = vpop.f32.mrf.mxu1 }
 0x11f   : > { %1483 = vst [vmem:[%s2328_s15 + $0x1c8] sm:$0xff] %v1419_v3  ;;  %v1173_v12 = vadd.f32 %v2307_v40, %v830_v10  ;;  %v1189_v13 = vadd.f32 %v2307_v40, %v870_v11 }
 0x120   : > { %1436 = vst [vmem:[%s2328_s15 + $0x50] sm:$0xff] %v1372_v4  ;;  %v1272_v14 = vmul.f32 %v2312_v41, %v1204_v8  ;;  %v1288_v15 = vmul.f32 %v2312_v41, %v1220_v9 }
 0x121   : > { %1452 = vst [vmem:[%s2328_s15 + $0xd0] sm:$0xff] %v1388_v5  ;;  %v1241_v16 = vmul.f32 %v2312_v41, %v1173_v12  ;;  %v1257_v17 = vmul.f32 %v2312_v41, %v1189_v13 }
 0x122   : > { %v1340_v18 = vadd.f32 %v2318_v45, %v1272_v14  ;;  %v1356_v19 = vadd.f32 %v2318_v45, %v1288_v15 }
 0x123   : > { %v1309_v20 = vadd.f32 %v2318_v45, %v1241_v16  ;;  %v1325_v21 = vadd.f32 %v2318_v45, %v1257_v17 }
 0x124   : > { %v1404_v22 = vmax.f32 %v1340_v18, 0.0  ;;  %v1420_v23 = vmax.f32 %v1356_v19, 0.0 }
 0x125   : > { %v1373_v24 = vmax.f32 %v1309_v20, 0.0  ;;  %v1389_v25 = vmax.f32 %v1325_v21, 0.0  ;;  %v910_v26 = vpop.f32.mrf.mxu2  ;;  %v950_v27 = vpop.f32.mrf.mxu3 }
 0x126   : > { %1468 = vst [vmem:[%s2328_s15 + $0x150] sm:$0xff] %v1404_v22  ;;  %v1205_v28 = vadd.f32 %v2307_v40, %v910_v26  ;;  %v1221_v29 = vadd.f32 %v2307_v40, %v950_v27  ;;  %v833_v30 = vpop.f32.mrf.mxu0  ;;  %v873_v31 = vpop.f32.mrf.mxu1 }
 0x127   : > { %1484 = vst [vmem:[%s2328_s15 + $0x1d0] sm:$0xff] %v1420_v23  ;;  %v1174_v32 = vadd.f32 %v2307_v40, %v833_v30  ;;  %v1190_v33 = vadd.f32 %v2307_v40, %v873_v31 }
 0x128   : > { %1437 = vst [vmem:[%s2328_s15 + $0x58] sm:$0xff] %v1373_v24  ;;  %v1273_v34 = vmul.f32 %v2312_v41, %v1205_v28  ;;  %v1289_v35 = vmul.f32 %v2312_v41, %v1221_v29 }
 0x129   : > { %1453 = vst [vmem:[%s2328_s15 + $0xd8] sm:$0xff] %v1389_v25  ;;  %v1242_v36 = vmul.f32 %v2312_v41, %v1174_v32  ;;  %v1258_v37 = vmul.f32 %v2312_v41, %v1190_v33 }
 0x12a   : > { %v1341_v38 = vadd.f32 %v2318_v45, %v1273_v34  ;;  %v1357_v39 = vadd.f32 %v2318_v45, %v1289_v35 }
 0x12b   : > { %v1310_v42 = vadd.f32 %v2318_v45, %v1242_v36  ;;  %v1326_v43 = vadd.f32 %v2318_v45, %v1258_v37 }
 0x12c   : > { %v1405_v44 = vmax.f32 %v1341_v38, 0.0  ;;  %v1421_v46 = vmax.f32 %v1357_v39, 0.0 }
 0x12d   : > { %v1374_v47 = vmax.f32 %v1310_v42, 0.0  ;;  %v1390_v48 = vmax.f32 %v1326_v43, 0.0  ;;  %v913_v49 = vpop.f32.mrf.mxu2  ;;  %v953_v50 = vpop.f32.mrf.mxu3 }
 0x12e   : > { %1469 = vst [vmem:[%s2328_s15 + $0x158] sm:$0xff] %v1405_v44  ;;  %v1206_v51 = vadd.f32 %v2307_v40, %v913_v49  ;;  %v1222_v52 = vadd.f32 %v2307_v40, %v953_v50  ;;  %v835_v53 = vpop.f32.mrf.mxu0  ;;  %v875_v54 = vpop.f32.mrf.mxu1 }
 0x12f   : > { %1485 = vst [vmem:[%s2328_s15 + $0x1d8] sm:$0xff] %v1421_v46  ;;  %v1175_v55 = vadd.f32 %v2307_v40, %v835_v53  ;;  %v1191_v56 = vadd.f32 %v2307_v40, %v875_v54 }
 0x130   : > { %1438 = vst [vmem:[%s2328_s15 + $0x60] sm:$0xff] %v1374_v47  ;;  %v1274_v57 = vmul.f32 %v2312_v41, %v1206_v51  ;;  %v1290_v58 = vmul.f32 %v2312_v41, %v1222_v52 }
 0x131   : > { %1454 = vst [vmem:[%s2328_s15 + $0xe0] sm:$0xff] %v1390_v48  ;;  %v1243_v59 = vmul.f32 %v2312_v41, %v1175_v55  ;;  %v1259_v60 = vmul.f32 %v2312_v41, %v1191_v56 }
 0x132   : > { %v1342_v61 = vadd.f32 %v2318_v45, %v1274_v57  ;;  %v1358_v62 = vadd.f32 %v2318_v45, %v1290_v58 }
 0x133   : > { %v1311_v63 = vadd.f32 %v2318_v45, %v1243_v59  ;;  %v1327_v0 = vadd.f32 %v2318_v45, %v1259_v60 }
 0x134   : > { %v1406_v1 = vmax.f32 %v1342_v61, 0.0  ;;  %v1422_v2 = vmax.f32 %v1358_v62, 0.0 }
 0x135   : > { %v1375_v3 = vmax.f32 %v1311_v63, 0.0  ;;  %v1391_v4 = vmax.f32 %v1327_v0, 0.0  ;;  %v915_v5 = vpop.f32.mrf.mxu2  ;;  %v955_v6 = vpop.f32.mrf.mxu3 }
 0x136   : > { %1470 = vst [vmem:[%s2328_s15 + $0x160] sm:$0xff] %v1406_v1  ;;  %v1207_v7 = vadd.f32 %v2307_v40, %v915_v5  ;;  %v1223_v8 = vadd.f32 %v2307_v40, %v955_v6  ;;  %v838_v9 = vpop.f32.mrf.mxu0  ;;  %v878_v10 = vpop.f32.mrf.mxu1 }
 0x137   : > { %1486 = vst [vmem:[%s2328_s15 + $0x1e0] sm:$0xff] %v1422_v2  ;;  %v1176_v11 = vadd.f32 %v2307_v40, %v838_v9  ;;  %v1192_v12 = vadd.f32 %v2307_v40, %v878_v10 }
 0x138   : > { %1439 = vst [vmem:[%s2328_s15 + $0x68] sm:$0xff] %v1375_v3  ;;  %v1275_v13 = vmul.f32 %v2312_v41, %v1207_v7  ;;  %v1291_v14 = vmul.f32 %v2312_v41, %v1223_v8 }
 0x139   : > { %1455 = vst [vmem:[%s2328_s15 + $0xe8] sm:$0xff] %v1391_v4  ;;  %v1244_v15 = vmul.f32 %v2312_v41, %v1176_v11  ;;  %v1260_v16 = vmul.f32 %v2312_v41, %v1192_v12 }
 0x13a   : > { %v1343_v17 = vadd.f32 %v2318_v45, %v1275_v13  ;;  %v1359_v18 = vadd.f32 %v2318_v45, %v1291_v14 }
 0x13b   : > { %v1312_v19 = vadd.f32 %v2318_v45, %v1244_v15  ;;  %v1328_v20 = vadd.f32 %v2318_v45, %v1260_v16 }
 0x13c   : > { %v1407_v21 = vmax.f32 %v1343_v17, 0.0  ;;  %v1423_v22 = vmax.f32 %v1359_v18, 0.0 }
 0x13d   : > { %v1376_v23 = vmax.f32 %v1312_v19, 0.0  ;;  %v1392_v24 = vmax.f32 %v1328_v20, 0.0  ;;  %v918_v25 = vpop.f32.mrf.mxu2  ;;  %v958_v26 = vpop.f32.mrf.mxu3 }
 0x13e   : > { %1471 = vst [vmem:[%s2328_s15 + $0x168] sm:$0xff] %v1407_v21  ;;  %v1208_v27 = vadd.f32 %v2307_v40, %v918_v25  ;;  %v1224_v28 = vadd.f32 %v2307_v40, %v958_v26  ;;  %v840_v29 = vpop.f32.mrf.mxu0  ;;  %v880_v30 = vpop.f32.mrf.mxu1 }
 0x13f   : > { %1487 = vst [vmem:[%s2328_s15 + $0x1e8] sm:$0xff] %v1423_v22  ;;  %v1177_v31 = vadd.f32 %v2307_v40, %v840_v29  ;;  %v1193_v32 = vadd.f32 %v2307_v40, %v880_v30 }
 0x140   : > { %1440 = vst [vmem:[%s2328_s15 + $0x70] sm:$0xff] %v1376_v23  ;;  %v1276_v33 = vmul.f32 %v2312_v41, %v1208_v27  ;;  %v1292_v34 = vmul.f32 %v2312_v41, %v1224_v28 }
 0x141   : > { %1456 = vst [vmem:[%s2328_s15 + $0xf0] sm:$0xff] %v1392_v24  ;;  %v1245_v35 = vmul.f32 %v2312_v41, %v1177_v31  ;;  %v1261_v36 = vmul.f32 %v2312_v41, %v1193_v32 }
 0x142   : > { %v1344_v37 = vadd.f32 %v2318_v45, %v1276_v33  ;;  %v1360_v38 = vadd.f32 %v2318_v45, %v1292_v34 }
 0x143   : > { %v1313_v39 = vadd.f32 %v2318_v45, %v1245_v35  ;;  %v1329_v42 = vadd.f32 %v2318_v45, %v1261_v36 }
 0x144   : > { %v1408_v43 = vmax.f32 %v1344_v37, 0.0  ;;  %v1424_v44 = vmax.f32 %v1360_v38, 0.0 }
 0x145   : > { %v1377_v46 = vmax.f32 %v1313_v39, 0.0  ;;  %v1393_v47 = vmax.f32 %v1329_v42, 0.0  ;;  %v920_v48 = vpop.f32.mrf.mxu2  ;;  %v960_v49 = vpop.f32.mrf.mxu3 }
 0x146   : > { %1472 = vst [vmem:[%s2328_s15 + $0x170] sm:$0xff] %v1408_v43  ;;  %v1209_v50 = vadd.f32 %v2307_v40, %v920_v48  ;;  %v1225_v51 = vadd.f32 %v2307_v40, %v960_v49 }
 0x147   : > { %1488 = vst [vmem:[%s2328_s15 + $0x1f0] sm:$0xff] %v1424_v44 }
 0x148   : > { %1441 = vst [vmem:[%s2328_s15 + $0x78] sm:$0xff] %v1377_v46  ;;  %v1277_v52 = vmul.f32 %v2312_v41, %v1209_v50  ;;  %v1293_v53 = vmul.f32 %v2312_v41, %v1225_v51 }
 0x149   : > { %1457 = vst [vmem:[%s2328_s15 + $0xf8] sm:$0xff] %v1393_v47 }
 0x14a   : > { %v1345_v54 = vadd.f32 %v2318_v45, %v1277_v52  ;;  %v1361_v40 = vadd.f32 %v2318_v45, %v1293_v53 }
 0x14c   : > { %v1409_v55 = vmax.f32 %v1345_v54, 0.0  ;;  %v1425_v56 = vmax.f32 %v1361_v40, 0.0 }
 0x14e   : > { %1473 = vst [vmem:[%s2328_s15 + $0x178] sm:$0xff] %v1409_v55 }
 0x14f   : > { %1489 = vst [vmem:[%s2328_s15 + $0x1f8] sm:$0xff] %v1425_v56 }
 0x150   : > { %2058 = shalt.err (!%p2055_p12)
}
 0x151   : > { %s2122_s14 = smov 128   ;;  %s2123_s8 = smov 8  }
 0x152   : > { %1897 = dma.vmem_to_hbm [thread:$0]  (%p2235_p3), %s1505_s21, 8192, %s1507_s10, %s1491_s27, %s2122_s14, %s2122_s14, %s2123_s8  }
 0x153 PF: > { %p1914_p13 = scmp.ge.s32.totalorder %s2117_s23, 2  ;;  %s1521_s13 = sand.u32 1, %s2097_s18  }
 0x154   : > { %s1522_s15 = scalar_lea.sflag [#allocation5], %s1521_s13 }
 0x155   : > { %p1908_p0 = pnand %p1914_p13, %p2203_p6 }
 0x157   : > { %p1909_p5 = pneg %p1908_p0 }
 0x159   : > { %2092 = dma.done.wait (%p1909_p5), %s1522_s15, 8192  }
 0x15a   : > { %2094 = vsyncadd (%p1909_p5), %s1522_s15, 4294959104  ;;  %s22_s23 = sadd.s32 1, %s2117_s23   ;;  %s2640_s16 = sld [smem:[#allocation13_spill]] }
 0x15b   : > { %p19_p7 = scmp.ge.s32.totalorder %s22_s23, 6   ;;  %s2641_s18 = smov %s2101_s19 }
 0x15c   : > { %s2642_s19 = smov %s2105_s20  ;;  %s2643_s20 = smov %s2244_s30 }
 0x15d   : > { %s2644_s21 = smov %s2113_s22  ;;  %21 = sbr.rel (!%p19_p7) target bundleno = 9 (0x9), region = 107 }
 0x160   : > { %s2645_s22 = smov %s2640_s16 }
 0x162   :  { %1528 = vsyncpa [#allocation4], 1 }
 0x163   :  { %1530 = vsyncpa [#allocation4 + $0x1], 1 }
 0x164   :  { %1531 = vsyncpa [#allocation7], 1 }
 0x165   :  { %1532 = vsyncpa [#allocation5], 1 }
 0x166   :  { %1534 = vsyncpa [#allocation5 + $0x1], 1 }

</bundles_post_ra>
